<compile_context>
chip_gen: v5e
topology: v5e:2x2
jax: 0.10.0
libtpu: 0.0.40
codegen_flags: <defaults>
</compile_context>

<pallas_src>
import jax
import jax.numpy as jnp
from jax.experimental import pallas as pl
from jax.experimental.pallas import tpu as pltpu


_LOG_CLAMP = -100.0          # PyTorch clamps each log term at -100
_MIN_LANE = 128              # minimum lane-dense width
_LANE_CHOICES = (1024, 512, 256, 128)
_TARGET_BLOCK_BYTES = 4 << 20  # ~4 MiB per buffer per array


def _bce_kernel(p_ref, t_ref, o_ref):
    # Upcast in-kernel: loss math in f32 regardless of I/O dtype.
    p = p_ref[...].astype(jnp.float32)
    t = t_ref[...].astype(jnp.float32)
    log_p = jnp.maximum(jnp.log(p), _LOG_CLAMP)          # EUP
    log_1mp = jnp.maximum(jnp.log(1.0 - p), _LOG_CLAMP)  # EUP (single op, matches torch)
    loss = -(t * log_p + (1.0 - t) * log_1mp)            # VPU (free under mem bound)
    o_ref[...] = loss.astype(o_ref.dtype)


def _bce_math_f32(p, t):
    """Plain-jnp BCE (f32 math), used for tiny tails and as reference."""
    pf = p.astype(jnp.float32)
    tf = t.astype(jnp.float32)
    log_p = jnp.maximum(jnp.log(pf), _LOG_CLAMP)
    log_1mp = jnp.maximum(jnp.log(1.0 - pf), _LOG_CLAMP)
    return -(tf * log_p + (1.0 - tf) * log_1mp)


def _round_down(x, m):
    return (x // m) * m


def _bce_pallas_flat(p, t, out_dtype):
    """Run the kernel on flat arrays whose length is a multiple of 128."""
    n = p.shape[0]
    itemsize = jnp.dtype(out_dtype).itemsize
    sublane = max(8, 32 // itemsize)  # 8 f32, 16 bf16, 32 int8/fp8

    # Adaptive lane width: largest power-of-two multiple of 128 dividing n
    # -> no padding, free reshape.
    lane_cols = _MIN_LANE
    for cols in _LANE_CHOICES:
        if n % cols == 0:
            lane_cols = cols
            break
    rows = n // lane_cols

    # ~4 MiB per DMA'd buffer, rounded to a sublane multiple.
    max_rows = max(sublane,
                   _round_down(_TARGET_BLOCK_BYTES // (lane_cols * itemsize),
                               sublane))

    if rows > max_rows:
        row_block = max_rows
    elif rows >= 2 * sublane:
        # Ensure >=2 grid blocks so a v7x megacore can use both TensorCores.
        row_block = max(sublane, _round_down(rows // 2, sublane))
    else:
        # Single full-extent block (legal even when rows < sublane multiple).
        row_block = rows

    num_blocks = pl.cdiv(rows, row_block)

    p2 = p.reshape(rows, lane_cols)
    t2 = t.reshape(rows, lane_cols)

    bytes_accessed = n * (p2.dtype.itemsize
                          + t2.dtype.itemsize
                          + jnp.dtype(out_dtype).itemsize)
    cost = pl.CostEstimate(
        flops=7 * n,
        transcendentals=2 * n,
        bytes_accessed=bytes_accessed,
    )

    out2 = pl.pallas_call(
        _bce_kernel,
        out_shape=jax.ShapeDtypeStruct((rows, lane_cols), out_dtype),
        grid=(num_blocks,),
        in_specs=[
            pl.BlockSpec((row_block, lane_cols), lambda i: (i, 0)),
            pl.BlockSpec((row_block, lane_cols), lambda i: (i, 0)),
        ],
        out_specs=pl.BlockSpec((row_block, lane_cols), lambda i: (i, 0)),
        compiler_params=pltpu.CompilerParams(
            dimension_semantics=("parallel",),
            vmem_limit_bytes=48 << 20,
        ),
        cost_estimate=cost,
    )(p2, t2)

    return out2.reshape(-1)


def bce_loss_none(tensor1, tensor2):
    """Elementwise binary cross entropy, reduction='none' (PyTorch BCELoss).

    tensor1: predicted probabilities in [0, 1]  (NCHW or any shape)
    tensor2: targets in [0, 1], same shape
    """
    assert tensor1.shape == tensor2.shape
    orig_shape = tensor1.shape
    out_dtype = tensor1.dtype

    p = tensor1.reshape(-1)
    t = tensor2.reshape(-1)
    n = p.shape[0]

    if n == 0:
        return jnp.zeros(orig_shape, out_dtype)

    n_main = (n // _MIN_LANE) * _MIN_LANE

    if n_main == 0:
        # Tiny input (< 128 elements): plain jnp is cheaper than a kernel call.
        return _bce_math_f32(p, t).astype(out_dtype).reshape(orig_shape)

    if n_main == n:
        # Common case: no padding, no slicing, no extra HBM round trips.
        out_flat = _bce_pallas_flat(p, t, out_dtype)
    else:
        # Ragged case: bulk through the kernel, <128-element tail via jnp.
        main = _bce_pallas_flat(p[:n_main], t[:n_main], out_dtype)
        tail = _bce_math_f32(p[n_main:], t[n_main:]).astype(out_dtype)
        out_flat = jnp.concatenate([main, tail])

    return out_flat.reshape(orig_shape)


def _bce_ref(p, t):
    return _bce_math_f32(p, t).astype(p.dtype)


if __name__ == "__main__":
    key = jax.random.PRNGKey(0)
    k1, k2, k3, k4 = jax.random.split(key, 4)

    # Main test: NCHW, small shape (n = 2048, divisible fast path).
    shape = (2, 4, 16, 16)
    tensor1 = jax.nn.sigmoid(jax.random.normal(k1, shape, jnp.float32))  # probs in (0,1)
    tensor2 = jax.random.uniform(k2, shape, jnp.float32)                 # targets in [0,1]

    out = bce_loss_none(tensor1, tensor2)
    out = jax.block_until_ready(out)

    ref = _bce_ref(tensor1, tensor2)
    assert out.shape == shape
    assert out.dtype == tensor1.dtype
    assert jnp.allclose(out, ref, atol=1e-5, rtol=1e-5), "mismatch vs reference"

    # Secondary test: ragged element count (648 -> 640 via kernel + 8-elem tail).
    shape2 = (2, 4, 9, 9)
    a = jax.nn.sigmoid(jax.random.normal(k3, shape2, jnp.float32))
    b = jax.random.uniform(k4, shape2, jnp.float32)
    out2 = jax.block_until_ready(bce_loss_none(a, b))
    assert out2.shape == shape2
    assert jnp.allclose(out2, _bce_ref(a, b), atol=1e-5, rtol=1e-5), "ragged mismatch"

    print("KERNEL_OK")
</pallas_src>

<mosaic_0001>
module attributes {stable_mosaic.version = 11 : i64} {
  func.func @_bce_kernel(%arg0: i32, %arg1: memref<2x1024xf32, #tpu.memory_space<vmem>>, %arg2: memref<2x1024xf32, #tpu.memory_space<vmem>>, %arg3: memref<2x1024xf32, #tpu.memory_space<vmem>>) attributes {dimension_semantics = [#tpu.dimension_semantics<parallel>], iteration_bounds = array<i64: 1>, scalar_prefetch = 0 : i64, scratch_operands = 0 : i64, tpu.core_type = #tpu.core_type<tc>, window_params = [{transform_indices = @transform_0, window_bounds = array<i64: 2, 1024>}, {transform_indices = @transform_1, window_bounds = array<i64: 2, 1024>}, {transform_indices = @transform_2, window_bounds = array<i64: 2, 1024>}]} {
    %c0 = arith.constant 0 : index
    %c0_0 = arith.constant 0 : index
    %0 = vector.load %arg1[%c0, %c0_0] : memref<2x1024xf32, #tpu.memory_space<vmem>>, vector<2x1024xf32>
    %c0_1 = arith.constant 0 : index
    %c0_2 = arith.constant 0 : index
    %1 = vector.load %arg2[%c0_1, %c0_2] : memref<2x1024xf32, #tpu.memory_space<vmem>>, vector<2x1024xf32>
    %2 = math.log %0 : vector<2x1024xf32>
    %cst = arith.constant -1.000000e+02 : f32
    %3 = vector.broadcast %cst : f32 to vector<2x1024xf32>
    %4 = arith.maximumf %2, %3 : vector<2x1024xf32>
    %cst_3 = arith.constant 1.000000e+00 : f32
    %5 = vector.broadcast %cst_3 : f32 to vector<2x1024xf32>
    %6 = arith.subf %5, %0 : vector<2x1024xf32>
    %7 = math.log %6 : vector<2x1024xf32>
    %cst_4 = arith.constant -1.000000e+02 : f32
    %8 = vector.broadcast %cst_4 : f32 to vector<2x1024xf32>
    %9 = arith.maximumf %7, %8 : vector<2x1024xf32>
    %10 = arith.mulf %1, %4 : vector<2x1024xf32>
    %cst_5 = arith.constant 1.000000e+00 : f32
    %11 = vector.broadcast %cst_5 : f32 to vector<2x1024xf32>
    %12 = arith.subf %11, %1 : vector<2x1024xf32>
    %13 = arith.mulf %12, %9 : vector<2x1024xf32>
    %14 = arith.addf %10, %13 : vector<2x1024xf32>
    %cst_6 = arith.constant 0.000000e+00 : f32
    %15 = vector.broadcast %cst_6 : f32 to vector<2x1024xf32>
    %16 = arith.subf %15, %14 : vector<2x1024xf32>
    %c0_7 = arith.constant 0 : index
    %c0_8 = arith.constant 0 : index
    %17 = vector.load %arg3[%c0_7, %c0_8] : memref<2x1024xf32, #tpu.memory_space<vmem>>, vector<2x1024xf32>
    tpu.vector_store %arg3[%c0_7, %c0_8], %16 {strides = array<i32>} : memref<2x1024xf32, #tpu.memory_space<vmem>>, vector<2x1024xf32>,
    return
  }
  func.func @transform_0(%arg0: i32) -> (i32, i32) {
    %c0_i32 = arith.constant 0 : i32
    %c0_i32_0 = arith.constant 0 : i32
    return %arg0, %c0_i32 : i32, i32
  }
  func.func @transform_1(%arg0: i32) -> (i32, i32) {
    %c0_i32 = arith.constant 0 : i32
    %c0_i32_0 = arith.constant 0 : i32
    return %arg0, %c0_i32 : i32, i32
  }
  func.func @transform_2(%arg0: i32) -> (i32, i32) {
    %c0_i32 = arith.constant 0 : i32
    %c0_i32_0 = arith.constant 0 : i32
    return %arg0, %c0_i32 : i32, i32
  }
}

</mosaic_0001>

<bundles_post_ra>
// kernel: tpu_custom_call.1
= control target key start
LH: loop header
LB: loop body
LE: loop exit
PB: predicated region body
PF: predicated region fallthrough
CT: control target
= control target key end

     0   :  { %7 = vsyncpa [#allocation3], 0  ;;  %s204_s0 = inlined_call_operand.hbm [shape: f32[2,1024], index: 0, kind: input, shape index: {}]   ;;  %s205_s1 = inlined_call_operand.hbm [shape: f32[2,1024], index: 1, kind: input, shape index: {}]   ;;  %s206_s2 = inlined_call_operand.hbm [shape: f32[2,1024], index: 2, kind: output, shape index: {}]  }
   0x1   :  { %8 = vsyncpa [#allocation6], 0 }
   0x2   :  { %9 = vsyncpa [#allocation4], 0  ;;  %s15_s11 = sshll.u32 %s204_s0, 4  ;;  %s177_s12 = smov [#allocation2]   ;;  %s16_s11 = int_to_ptr.hbm [resolvable:$true] %s15_s11 }
   0x3   :  { %s17_s13 = sshll.u32 %s177_s12, 4  ;;  %s26_s16 = sshll.u32 %s205_s1, 4  ;;  %s18_s13 = int_to_ptr.vmem [resolvable:$true] %s17_s13  ;;  %s27_s16 = int_to_ptr.hbm [resolvable:$true] %s26_s16 }
   0x4   :  { %20 = dma.hbm_to_vmem [thread:$0]  %s16_s11, 256, %s18_s13, [#allocation3]  }
   0x5   :  { %s178_s17 = smov [#allocation5]  }
   0x6   :  { %s28_s18 = sshll.u32 %s178_s17, 4  ;;  %s29_s18 = int_to_ptr.vmem [resolvable:$true] %s28_s18 }
   0x7   :  { %31 = dma.hbm_to_vmem [thread:$0]  %s27_s16, 256, %s29_s18, [#allocation6]  }
   0x8   :  { %171 = dma.done.wait [#allocation3], 256  }
   0x9   :  { %172 = vsyncadd [#allocation3], 4294967040 }
   0xa   :  { %173 = dma.done.wait [#allocation6], 256  }
   0xb   :  { %174 = vsyncadd [#allocation6], 4294967040  ;;  %v40_v0 = vld [vmem:[#allocation2] sm:$0xff]  ;;  %v41_v1 = vld [vmem:[#allocation2 + $0x8] sm:$0xff]  ;;  %s179_s0 = smov [#allocation7]   ;;  %s77_s21 = sshll.u32 %s206_s2, 4  ;;  %s78_s21 = int_to_ptr.hbm [resolvable:$true] %s77_s21 }
   0xc   :  { %91 = vlog2.f32 %v40_v0  ;;  %v50_v2 = vsub.f32 1.0, %v40_v0  ;;  %v51_v3 = vsub.f32 1.0, %v41_v1  ;;  %v42_v5 = vld [vmem:[#allocation5] sm:$0xff]  ;;  %v43_v8 = vld [vmem:[#allocation5 + $0x8] sm:$0xff]  ;;  %s75_s1 = sshll.u32 %s179_s0, 4  ;;  %s76_s1 = int_to_ptr.vmem [resolvable:$true] %s75_s1 }
   0xd   :  { %93 = vlog2.f32 %v41_v1  ;;  %v60_v14 = vsub.f32 1.0, %v42_v5  ;;  %v61_v17 = vsub.f32 1.0, %v43_v8 }
   0xe   :  { %95 = vlog2.f32 %v50_v2 }
   0xf   :  { %97 = vlog2.f32 %v51_v3 }
  0x12   :  { %v92_v4 = vpop.eup %91 }
  0x13   :  { %v94_v6 = vpop.eup %93  ;;  %v45_v7 = vmul.f32 0.6931472, %v92_v4 }
  0x14   :  { %v96_v9 = vpop.eup %95  ;;  %v47_v10 = vmul.f32 0.6931472, %v94_v6 }
  0x15   :  { %v98_v11 = vpop.eup %97  ;;  %v48_v12 = vmax.f32 %v45_v7, -100.0  ;;  %v53_v13 = vmul.f32 0.6931472, %v96_v9 }
  0x16   :  { %v49_v15 = vmax.f32 %v47_v10, -100.0  ;;  %v55_v16 = vmul.f32 0.6931472, %v98_v11 }
  0x17   :  { %v56_v18 = vmax.f32 %v53_v13, -100.0  ;;  %v58_v19 = vmul.f32 %v48_v12, %v42_v5 }
  0x18   :  { %v57_v20 = vmax.f32 %v55_v16, -100.0  ;;  %v59_v21 = vmul.f32 %v49_v15, %v43_v8 }
  0x19   :  { %v62_v22 = vmul.f32 %v60_v14, %v56_v18 }
  0x1a   :  { %v63_v23 = vmul.f32 %v61_v17, %v57_v20 }
  0x1b   :  { %v64_v24 = vadd.f32 %v62_v22, %v58_v19 }
  0x1c   :  { %v65_v25 = vadd.f32 %v63_v23, %v59_v21 }
  0x1d   :  { %v66_v26 = vsub.f32 0.0, %v64_v24 }
  0x1e   :  { %v67_v27 = vsub.f32 0.0, %v65_v25 }
  0x1f   :  { %68 = vst [vmem:[#allocation7] sm:$0xff] %v66_v26 }
  0x20   :  { %69 = vst [vmem:[#allocation7 + $0x8] sm:$0xff] %v67_v27 }
  0x21   :  { %80 = dma.vmem_to_hbm [thread:$0]  %s76_s1, 256, %s78_s21, [#allocation4]  }
  0x22   :  { %175 = dma.done.wait [#allocation4], 256  }
  0x23   :  { %176 = vsyncadd [#allocation4], 4294967040 }
  0x24   :  { %85 = vsyncpa [#allocation3], 1 }
  0x25   :  { %86 = vsyncpa [#allocation6], 1 }
  0x26   :  { %87 = vsyncpa [#allocation4], 1 }

</bundles_post_ra>
